<compile_context>
chip_gen: v6e
topology: v6e:2x2x1
jax: 0.10.0
libtpu: 0.0.40
codegen_flags: <defaults>
</compile_context>

<pallas_src>
import jax
import jax.numpy as jnp
from jax.experimental import pallas as pl
from jax.experimental.pallas import tpu as pltpu


def _emb2celltype_kernel(x_ref, wconv_ref, bc_ref,
                         w1_ref, b1_ref, w2_ref, b2_ref, w3_ref, b3_ref,
                         o_ref):
    # ---- conv1 as an MXU matmul against the block-diagonal conv weight ------
    # x_ref: (tb, S*E) bf16, wconv_ref: (S*E, S) bf16 -> y: (tb, S) f32
    y = jnp.dot(x_ref[...], wconv_ref[...], preferred_element_type=jnp.float32)
    y = jnp.maximum(y + bc_ref[0, 0], 0.0)         # conv bias (SMEM scalar) + ReLU

    # ---- fc1 -> relu ----------------------------------------------------------
    h1 = jnp.dot(y, w1_ref[...], preferred_element_type=jnp.float32) + b1_ref[...]
    h1 = jnp.maximum(h1, 0.0)

    # ---- fc2 -> relu ----------------------------------------------------------
    h2 = jnp.dot(h1, w2_ref[...], preferred_element_type=jnp.float32) + b2_ref[...]
    h2 = jnp.maximum(h2, 0.0)

    # ---- fc3 (output columns zero-padded to a lane-dense width) ---------------
    out = jnp.dot(h2, w3_ref[...], preferred_element_type=jnp.float32) + b3_ref[...]
    o_ref[...] = out.astype(o_ref.dtype)


def _choose_tb(B, tb_target):
    """Batch-tile: whole batch if small; else multiple of 8, and for big
    batches capped so the grid has >=4 steps (v7x dual-TC + pipelining)."""
    if B <= tb_target and B <= 1024:
        return B                                   # single grid step, full-extent block
    tb = max(8, (min(tb_target, B) // 8) * 8)
    if B >= 2048:
        cap = max(8, (pl.cdiv(B, 4) // 8) * 8)     # >=4 grid steps
        tb = min(tb, cap)
    return tb


def emb2celltype(x, params, *, tb=2048, x_dtype=jnp.bfloat16,
                 vmem_limit_bytes=48 * 1024 * 1024):
    B, S, E = x.shape
    h_dim = params["w2"].shape[1]
    out_dim = params["w3"].shape[1]
    out_pad = ((out_dim + 127) // 128) * 128       # lane-dense output width

    # --- host-side layout plumbing (free relative to the x DMA) ---------------
    # Ship x as bf16, flattened to (B, S*E) for a contiguous lane-dense tile.
    x_flat = x.reshape(B, S * E).astype(x_dtype)

    # Block-diagonal conv weight: W[s*E + e, s] = wc[e]  -> conv1 == one matmul.
    wc_vec = params["wc"][0].astype(x_dtype)                             # (E,)
    wconv = (jnp.eye(S, dtype=x_dtype)[:, None, :] * wc_vec[None, :, None]
             ).reshape(S * E, S)                                         # (S*E, S)

    # Zero-pad fc3 to the lane-dense output width.
    w3p = jnp.zeros((h_dim, out_pad), jnp.float32).at[:, :out_dim].set(params["w3"])
    b3p = jnp.zeros((1, out_pad), jnp.float32).at[:, :out_dim].set(params["b3"])

    # Batch tiling (+ pad B so every grid step reads defined rows).
    tb_eff = _choose_tb(B, tb)
    n_steps = pl.cdiv(B, tb_eff)
    B_pad = n_steps * tb_eff
    if B_pad != B:
        x_flat = jnp.pad(x_flat, ((0, B_pad - B), (0, 0)))

    grid = (n_steps,)
    const2 = lambda i: (0, 0)                      # weights: fetch once, keep resident

    in_specs = [
        pl.BlockSpec((tb_eff, S * E), lambda i: (i, 0)),
        pl.BlockSpec((S * E, S), const2),
        pl.BlockSpec((1, 1), const2, memory_space=pltpu.MemorySpace.SMEM),
        pl.BlockSpec((S, 512), const2),
        pl.BlockSpec((1, 512), const2),
        pl.BlockSpec((512, h_dim), const2),
        pl.BlockSpec((1, h_dim), const2),
        pl.BlockSpec((h_dim, out_pad), const2),
        pl.BlockSpec((1, out_pad), const2),
    ]
    out_specs = pl.BlockSpec((tb_eff, out_pad), lambda i: (i, 0))

    flops = 2 * B * (S * E + S * 512 + 512 * h_dim + h_dim * out_dim)
    bytes_accessed = (int(x_flat.size) * jnp.dtype(x_dtype).itemsize
                      + B * out_pad * 4
                      + sum(int(p.size) * p.dtype.itemsize for p in params.values()))
    cost = pl.CostEstimate(flops=flops, transcendentals=0,
                           bytes_accessed=bytes_accessed)

    out = pl.pallas_call(
        _emb2celltype_kernel,
        out_shape=jax.ShapeDtypeStruct((B_pad, out_pad), jnp.float32),
        grid=grid,
        in_specs=in_specs,
        out_specs=out_specs,
        compiler_params=pltpu.CompilerParams(
            dimension_semantics=("parallel",),
            vmem_limit_bytes=vmem_limit_bytes),
        cost_estimate=cost,
    )(x_flat, wconv, params["bc"],
      params["w1"], params["b1"],
      params["w2"], params["b2"],
      w3p, b3p)

    return out[:B, :out_dim]


def init_params(key, seq_len, emb_dim=200, h_dim=32, out_dim=10):
    ks = jax.random.split(key, 8)
    scale = 0.02
    return {
        # Conv2d(1,1,(1,emb_dim)) -> weight kept as (1, emb_dim), bias scalar (1,1)
        "wc": scale * jax.random.normal(ks[0], (1, emb_dim), jnp.float32),
        "bc": scale * jax.random.normal(ks[1], (1, 1), jnp.float32),
        # Linear weights stored as (in, out) (transpose of torch's (out, in))
        "w1": scale * jax.random.normal(ks[2], (seq_len, 512), jnp.float32),
        "b1": scale * jax.random.normal(ks[3], (1, 512), jnp.float32),
        "w2": scale * jax.random.normal(ks[4], (512, h_dim), jnp.float32),
        "b2": scale * jax.random.normal(ks[5], (1, h_dim), jnp.float32),
        "w3": scale * jax.random.normal(ks[6], (h_dim, out_dim), jnp.float32),
        "b3": scale * jax.random.normal(ks[7], (1, out_dim), jnp.float32),
    }


def _reference(x, p, x_dtype=jnp.bfloat16):
    # Mirror the kernel's bf16 ingest of x / conv weight (f32 accumulation).
    xq = x.astype(x_dtype).astype(jnp.float32)
    wcq = p["wc"][0].astype(x_dtype).astype(jnp.float32)
    y = jnp.maximum(jnp.einsum("bse,e->bs", xq, wcq) + p["bc"][0, 0], 0.0)
    h1 = jnp.maximum(y @ p["w1"] + p["b1"], 0.0)
    h2 = jnp.maximum(h1 @ p["w2"] + p["b2"], 0.0)
    return h2 @ p["w3"] + p["b3"]


if __name__ == "__main__":
    B, SEQ_LEN, EMB = 2, 8, 200          # gene_num=7 -> SEQ_LEN=8; conv kernel fixes EMB=200
    H_DIM, OUT_DIM = 32, 10

    key = jax.random.PRNGKey(0)
    kx, kp = jax.random.split(key)
    x = jax.random.normal(kx, (B, SEQ_LEN, EMB), jnp.float32)
    params = init_params(kp, SEQ_LEN, EMB, H_DIM, OUT_DIM)

    out = emb2celltype(x, params)
    out = jax.block_until_ready(out)

    ref = _reference(x, params)
    assert out.shape == (B, OUT_DIM)
    # bf16 x ingest -> looser tolerance than the pure-f32 path (validation artifact).
    assert jnp.allclose(out, ref, atol=2e-2, rtol=2e-2)

    print("KERNEL_OK")
</pallas_src>

<mosaic_0001>
module attributes {stable_mosaic.version = 11 : i64} {
  func.func @_emb2celltype_kernel(%arg0: i32, %arg1: memref<2x1600xbf16, #tpu.memory_space<vmem>>, %arg2: memref<1600x8xbf16, #tpu.memory_space<vmem>>, %arg3: memref<1x1xf32, #tpu.memory_space<smem>>, %arg4: memref<8x512xf32, #tpu.memory_space<vmem>>, %arg5: memref<1x512xf32, #tpu.memory_space<vmem>>, %arg6: memref<512x32xf32, #tpu.memory_space<vmem>>, %arg7: memref<1x32xf32, #tpu.memory_space<vmem>>, %arg8: memref<32x128xf32, #tpu.memory_space<vmem>>, %arg9: memref<1x128xf32, #tpu.memory_space<vmem>>, %arg10: memref<2x128xf32, #tpu.memory_space<vmem>>) attributes {dimension_semantics = [#tpu.dimension_semantics<parallel>], iteration_bounds = array<i64: 1>, scalar_prefetch = 0 : i64, scratch_operands = 0 : i64, tpu.core_type = #tpu.core_type<tc>, window_params = [{transform_indices = @transform_0, window_bounds = array<i64: 2, 1600>}, {pipeline_mode = #tpu.pipeline_mode<synchronous>, transform_indices = @transform_1, window_bounds = array<i64: 1600, 8>}, {transform_indices = @transform_2, window_bounds = array<i64: 1, 1>}, {pipeline_mode = #tpu.pipeline_mode<synchronous>, transform_indices = @transform_3, window_bounds = array<i64: 8, 512>}, {pipeline_mode = #tpu.pipeline_mode<synchronous>, transform_indices = @transform_4, window_bounds = array<i64: 1, 512>}, {pipeline_mode = #tpu.pipeline_mode<synchronous>, transform_indices = @transform_5, window_bounds = array<i64: 512, 32>}, {pipeline_mode = #tpu.pipeline_mode<synchronous>, transform_indices = @transform_6, window_bounds = array<i64: 1, 32>}, {pipeline_mode = #tpu.pipeline_mode<synchronous>, transform_indices = @transform_7, window_bounds = array<i64: 32, 128>}, {pipeline_mode = #tpu.pipeline_mode<synchronous>, transform_indices = @transform_8, window_bounds = array<i64: 1, 128>}, {transform_indices = @transform_9, window_bounds = array<i64: 2, 128>}]} {
    %c0 = arith.constant 0 : index
    %c0_0 = arith.constant 0 : index
    %0 = vector.load %arg1[%c0, %c0_0] : memref<2x1600xbf16, #tpu.memory_space<vmem>>, vector<2x1600xbf16>
    %c0_1 = arith.constant 0 : index
    %c0_2 = arith.constant 0 : index
    %1 = vector.load %arg2[%c0_1, %c0_2] : memref<1600x8xbf16, #tpu.memory_space<vmem>>, vector<1600x8xbf16>
    %cst = arith.constant dense<0.000000e+00> : vector<2x8xf32>
    %2 = tpu.matmul %0, %1, %cst {dimension_numbers = #tpu.dot_dimension_numbers<[1], [0], [0], [1], [0, 0, 1, 1], [], []>} : vector<2x1600xbf16>, vector<1600x8xbf16>, vector<2x8xf32> -> vector<2x8xf32>
    %c0_3 = arith.constant 0 : index
    %c0_4 = arith.constant 0 : index
    %3 = memref.load %arg3[%c0_3, %c0_4] : memref<1x1xf32, #tpu.memory_space<smem>>
    %4 = vector.broadcast %3 : f32 to vector<2x8xf32>
    %5 = arith.addf %2, %4 : vector<2x8xf32>
    %cst_5 = arith.constant 0.000000e+00 : f32
    %6 = vector.broadcast %cst_5 : f32 to vector<2x8xf32>
    %7 = arith.maximumf %5, %6 : vector<2x8xf32>
    %c0_6 = arith.constant 0 : index
    %c0_7 = arith.constant 0 : index
    %8 = vector.load %arg4[%c0_6, %c0_7] : memref<8x512xf32, #tpu.memory_space<vmem>>, vector<8x512xf32>
    %cst_8 = arith.constant dense<0.000000e+00> : vector<2x512xf32>
    %9 = tpu.matmul %7, %8, %cst_8 {dimension_numbers = #tpu.dot_dimension_numbers<[1], [0], [0], [1], [0, 0, 1, 1], [], []>} : vector<2x8xf32>, vector<8x512xf32>, vector<2x512xf32> -> vector<2x512xf32>
    %c0_9 = arith.constant 0 : index
    %c0_10 = arith.constant 0 : index
    %10 = vector.load %arg5[%c0_9, %c0_10] : memref<1x512xf32, #tpu.memory_space<vmem>>, vector<1x512xf32>
    %11 = vector.broadcast %10 : vector<1x512xf32> to vector<2x512xf32>
    %12 = arith.addf %9, %11 : vector<2x512xf32>
    %cst_11 = arith.constant 0.000000e+00 : f32
    %13 = vector.broadcast %cst_11 : f32 to vector<2x512xf32>
    %14 = arith.maximumf %12, %13 : vector<2x512xf32>
    %c0_12 = arith.constant 0 : index
    %c0_13 = arith.constant 0 : index
    %15 = vector.load %arg6[%c0_12, %c0_13] : memref<512x32xf32, #tpu.memory_space<vmem>>, vector<512x32xf32>
    %cst_14 = arith.constant dense<0.000000e+00> : vector<2x32xf32>
    %16 = tpu.matmul %14, %15, %cst_14 {dimension_numbers = #tpu.dot_dimension_numbers<[1], [0], [0], [1], [0, 0, 1, 1], [], []>} : vector<2x512xf32>, vector<512x32xf32>, vector<2x32xf32> -> vector<2x32xf32>
    %c0_15 = arith.constant 0 : index
    %c0_16 = arith.constant 0 : index
    %17 = vector.load %arg7[%c0_15, %c0_16] : memref<1x32xf32, #tpu.memory_space<vmem>>, vector<1x32xf32>
    %18 = vector.broadcast %17 : vector<1x32xf32> to vector<2x32xf32>
    %19 = arith.addf %16, %18 : vector<2x32xf32>
    %cst_17 = arith.constant 0.000000e+00 : f32
    %20 = vector.broadcast %cst_17 : f32 to vector<2x32xf32>
    %21 = arith.maximumf %19, %20 : vector<2x32xf32>
    %c0_18 = arith.constant 0 : index
    %c0_19 = arith.constant 0 : index
    %22 = vector.load %arg8[%c0_18, %c0_19] : memref<32x128xf32, #tpu.memory_space<vmem>>, vector<32x128xf32>
    %cst_20 = arith.constant dense<0.000000e+00> : vector<2x128xf32>
    %23 = tpu.matmul %21, %22, %cst_20 {dimension_numbers = #tpu.dot_dimension_numbers<[1], [0], [0], [1], [0, 0, 1, 1], [], []>} : vector<2x32xf32>, vector<32x128xf32>, vector<2x128xf32> -> vector<2x128xf32>
    %c0_21 = arith.constant 0 : index
    %c0_22 = arith.constant 0 : index
    %24 = vector.load %arg9[%c0_21, %c0_22] : memref<1x128xf32, #tpu.memory_space<vmem>>, vector<1x128xf32>
    %25 = vector.broadcast %24 : vector<1x128xf32> to vector<2x128xf32>
    %26 = arith.addf %23, %25 : vector<2x128xf32>
    %c0_23 = arith.constant 0 : index
    %c0_24 = arith.constant 0 : index
    %27 = vector.load %arg10[%c0_23, %c0_24] : memref<2x128xf32, #tpu.memory_space<vmem>>, vector<2x128xf32>
    tpu.vector_store %arg10[%c0_23, %c0_24], %26 {strides = array<i32>} : memref<2x128xf32, #tpu.memory_space<vmem>>, vector<2x128xf32>,
    return
  }
  func.func @transform_0(%arg0: i32) -> (i32, i32) {
    %c0_i32 = arith.constant 0 : i32
    %c0_i32_0 = arith.constant 0 : i32
    return %arg0, %c0_i32 : i32, i32
  }
  func.func @transform_1(%arg0: i32) -> (i32, i32) {
    %c0_i32 = arith.constant 0 : i32
    %c0_i32_0 = arith.constant 0 : i32
    %c0_i32_1 = arith.constant 0 : i32
    return %c0_i32, %c0_i32_0 : i32, i32
  }
  func.func @transform_2(%arg0: i32) -> (i32, i32) {
    %c0_i32 = arith.constant 0 : i32
    %c0_i32_0 = arith.constant 0 : i32
    %c0_i32_1 = arith.constant 0 : i32
    return %c0_i32, %c0_i32_0 : i32, i32
  }
  func.func @transform_3(%arg0: i32) -> (i32, i32) {
    %c0_i32 = arith.constant 0 : i32
    %c0_i32_0 = arith.constant 0 : i32
    %c0_i32_1 = arith.constant 0 : i32
    return %c0_i32, %c0_i32_0 : i32, i32
  }
  func.func @transform_4(%arg0: i32) -> (i32, i32) {
    %c0_i32 = arith.constant 0 : i32
    %c0_i32_0 = arith.constant 0 : i32
    %c0_i32_1 = arith.constant 0 : i32
    return %c0_i32, %c0_i32_0 : i32, i32
  }
  func.func @transform_5(%arg0: i32) -> (i32, i32) {
    %c0_i32 = arith.constant 0 : i32
    %c0_i32_0 = arith.constant 0 : i32
    %c0_i32_1 = arith.constant 0 : i32
    return %c0_i32, %c0_i32_0 : i32, i32
  }
  func.func @transform_6(%arg0: i32) -> (i32, i32) {
    %c0_i32 = arith.constant 0 : i32
    %c0_i32_0 = arith.constant 0 : i32
    %c0_i32_1 = arith.constant 0 : i32
    return %c0_i32, %c0_i32_0 : i32, i32
  }
  func.func @transform_7(%arg0: i32) -> (i32, i32) {
    %c0_i32 = arith.constant 0 : i32
    %c0_i32_0 = arith.constant 0 : i32
    %c0_i32_1 = arith.constant 0 : i32
    return %c0_i32, %c0_i32_0 : i32, i32
  }
  func.func @transform_8(%arg0: i32) -> (i32, i32) {
    %c0_i32 = arith.constant 0 : i32
    %c0_i32_0 = arith.constant 0 : i32
    %c0_i32_1 = arith.constant 0 : i32
    return %c0_i32, %c0_i32_0 : i32, i32
  }
  func.func @transform_9(%arg0: i32) -> (i32, i32) {
    %c0_i32 = arith.constant 0 : i32
    %c0_i32_0 = arith.constant 0 : i32
    return %arg0, %c0_i32 : i32, i32
  }
}

</mosaic_0001>

<bundles_post_ra>
// kernel: tpu_custom_call.1
= control target key start
LH: loop header
LB: loop body
LE: loop exit
PB: predicated region body
PF: predicated region fallthrough
CT: control target
= control target key end

     0   :  { %v245_v27 = vlaneseq  ;;  %v2183_v35 = vmov 1966171168   ;;  %s2813_s0 = inlined_call_operand.vmem [shape: bf16[2,1600], index: 0, kind: input, shape index: {}]   ;;  %s2814_s1 = inlined_call_operand.vmem [shape: bf16[1600,8], index: 1, kind: input, shape index: {}]   ;;  %s2815_s2 = inlined_call_operand.<no memory space> [shape: f32[1,1], index: 2, kind: input, shape index: {}]   ;;  %s2816_s3 = inlined_call_operand.vmem [shape: f32[8,512], index: 3, kind: input, shape index: {}]   ;;  %s2817_s4 = inlined_call_operand.vmem [shape: f32[1,512], index: 4, kind: input, shape index: {}]   ;;  %s2818_s5 = inlined_call_operand.vmem [shape: f32[512,32], index: 5, kind: input, shape index: {}]   ;;  %s2819_s6 = inlined_call_operand.vmem [shape: f32[1,32], index: 6, kind: input, shape index: {}]   ;;  %s2820_s7 = inlined_call_operand.vmem [shape: f32[32,128], index: 7, kind: input, shape index: {}]   ;;  %s2821_s8 = inlined_call_operand.vmem [shape: f32[1,128], index: 8, kind: input, shape index: {}]   ;;  %s2822_s9 = inlined_call_operand.hbm [shape: f32[2,128], index: 9, kind: output, shape index: {}]  }
   0x1   :  { %v2059_v0 = vld [vmem:[%s2814_s1 + $0x78] sm:$0xff]   ;;  %v2063_v4 = vld [vmem:[%s2814_s1 + $0x70] sm:$0xff]   ;;  %v2067_v8 = vld [vmem:[%s2814_s1 + $0x68] sm:$0xff]   ;;  %v243_v36 = vunpack.c.l.s4 %v2183_v35 }
   0x2   :  { %v2060_v1 = vld [vmem:[%s2814_s1 + $0x38] sm:$0xff]   ;;  %1820 = vmatprep.subr.bf16.mxu0 %v2059_v0  ;;  %v2064_v5 = vld [vmem:[%s2814_s1 + $0x30] sm:$0xff]   ;;  %v2068_v9 = vld [vmem:[%s2814_s1 + $0x28] sm:$0xff]   ;;  %v2330_v32 = vshrl.u32 %v245_v27, 7 }
   0x3   :  { %v2061_v2 = vld [vmem:[%s2814_s1 + $0xf8] sm:$0xff]   ;;  %1821 = vmatpush3.bf16.msra.mxu0 %v2060_v1  ;;  %v2065_v6 = vld [vmem:[%s2814_s1 + $0xf0] sm:$0xff]   ;;  %v2069_v10 = vld [vmem:[%s2814_s1 + $0xe8] sm:$0xff]   ;;  %v244_v39 = vunpack.c.0.s8 %v243_v36 }
   0x4   :  { %v2062_v3 = vld [vmem:[%s2814_s1 + $0xb8] sm:$0xff]   ;;  %1842 = vmatprep.subr.bf16.mxu1 %v2061_v2  ;;  %1822 = vmatprep.subr.bf16.mxu0 %v2063_v4  ;;  %v2066_v7 = vld [vmem:[%s2814_s1 + $0xb0] sm:$0xff]   ;;  %v2070_v11 = vld [vmem:[%s2814_s1 + $0xa8] sm:$0xff]  }
   0x5   :  { %1843 = vmatpush3.bf16.msra.mxu1 %v2062_v3  ;;  %v2071_v12 = vld [vmem:[%s2814_s1 + $0x60] sm:$0xff]   ;;  %v2075_v16 = vld [vmem:[%s2814_s1 + $0x58] sm:$0xff]   ;;  %v2079_v20 = vld [vmem:[%s2814_s1 + $0x50] sm:$0xff]   ;;  %v2345_v41 = vsub.s32 %v244_v39, %v2330_v32 }
   0x6   :  { %1844 = vmatprep.subr.bf16.mxu1 %v2065_v6  ;;  %v2072_v13 = vld [vmem:[%s2814_s1 + $0x20] sm:$0xff]   ;;  %v2076_v17 = vld [vmem:[%s2814_s1 + $0x18] sm:$0xff]   ;;  %v2080_v21 = vld [vmem:[%s2814_s1 + $0x10] sm:$0xff]  }
   0x7   :  { %1823 = vmatpush3.bf16.msra.mxu0 %v2064_v5  ;;  %v2073_v14 = vld [vmem:[%s2814_s1 + $0xe0] sm:$0xff]   ;;  %v2077_v18 = vld [vmem:[%s2814_s1 + $0xd8] sm:$0xff]   ;;  %v2081_v22 = vld [vmem:[%s2814_s1 + $0xd0] sm:$0xff]  }
   0x8   :  { %1824 = vmatprep.subr.bf16.mxu0 %v2067_v8  ;;  %v2074_v15 = vld [vmem:[%s2814_s1 + $0xa0] sm:$0xff]   ;;  %v2078_v19 = vld [vmem:[%s2814_s1 + $0x98] sm:$0xff]   ;;  %v2082_v23 = vld [vmem:[%s2814_s1 + $0x90] sm:$0xff]  }
   0x9   :  { %1845 = vmatpush3.bf16.msra.mxu1 %v2066_v7  ;;  %v2083_v24 = vld [vmem:[%s2814_s1 + $0x48] sm:$0xff]   ;;  %v2087_v29 = vld [vmem:[%s2814_s1 + $0x40] sm:$0xff]   ;;  %v2092_v37 = vld [vmem:[%s2814_s1 + $0x178] sm:$0xff]  }
   0xa   :  { %1846 = vmatprep.subr.bf16.mxu1 %v2069_v10  ;;  %v2084_v25 = vld [vmem:[%s2814_s1 + $0x8] sm:$0xff]   ;;  %v2088_v30 = vld [vmem:[%s2814_s1] sm:$0xff]   ;;  %v2094_v40 = vld [vmem:[%s2814_s1 + $0x1f8] sm:$0xff]  }
   0xb   :  { %1825 = vmatpush3.bf16.msra.mxu0 %v2068_v9  ;;  %v2085_v26 = vld [vmem:[%s2814_s1 + $0xc8] sm:$0xff]   ;;  %v2089_v31 = vld [vmem:[%s2814_s1 + $0xc0] sm:$0xff]   ;;  %v2093_v48 = vld [vmem:[%s2814_s1 + $0x138] sm:$0xff]  }
   0xc   :  { %1826 = vmatprep.subr.bf16.mxu0 %v2071_v12  ;;  %v2086_v28 = vld [vmem:[%s2814_s1 + $0x88] sm:$0xff]   ;;  %v35_v33 = vld [vmem:[%s2813_s0] sm:$0xff]  ;;  %v2096_v51 = vld [vmem:[%s2814_s1 + $0x170] sm:$0xff]  }
   0xd   :  { %1847 = vmatpush3.bf16.msra.mxu1 %v2070_v11  ;;  %v2091_v34 = vld [vmem:[%s2814_s1 + $0x80] sm:$0xff]   ;;  %v241_v38 = vcombine.high %v35_v33, %v35_v33  ;;  %v248_v42 = vrot.slane %v35_v33, %v2345_v41  ;;  %v2095_v53 = vld [vmem:[%s2814_s1 + $0x1b8] sm:$0xff]   ;;  %v2098_v54 = vld [vmem:[%s2814_s1 + $0x1f0] sm:$0xff]  }
   0xe   :  { %1848 = vmatprep.subr.bf16.mxu1 %v2073_v14  ;;  %v2097_v56 = vld [vmem:[%s2814_s1 + $0x130] sm:$0xff]   ;;  %v2100_v57 = vld [vmem:[%s2814_s1 + $0x168] sm:$0xff]   ;;  %v2104_v61 = vld [vmem:[%s2814_s1 + $0x160] sm:$0xff]  }
   0xf   :  { %1827 = vmatpush3.bf16.msra.mxu0 %v2072_v13  ;;  %v2349_v43 = vrot.slane %v241_v38, %v2345_v41  ;;  %v256_v44 = vcombine.high %v248_v42, %v248_v42  ;;  %v264_v45 = vrot.slane %v248_v42, %v2345_v41  ;;  %v2099_v58 = vld [vmem:[%s2814_s1 + $0x1b0] sm:$0xff]   ;;  %v2102_v59 = vld [vmem:[%s2814_s1 + $0x1e8] sm:$0xff]   ;;  %v2106_v63 = vld [vmem:[%s2814_s1 + $0x1e0] sm:$0xff]  }
  0x10   :  { %1828 = vmatprep.subr.bf16.mxu0 %v2075_v16  ;;  %v2101_v60 = vld [vmem:[%s2814_s1 + $0x128] sm:$0xff]   ;;  %v2105_v0 = vld [vmem:[%s2814_s1 + $0x120] sm:$0xff]   ;;  %v2108_v1 = vld [vmem:[%s2814_s1 + $0x158] sm:$0xff]  }
  0x11   :  { %1849 = vmatpush3.bf16.msra.mxu1 %v2074_v15  ;;  %v257_v46 = vcombine.high %v2349_v43, %v2349_v43  ;;  %v278_v47 = vrot.slane %v256_v44, %v2345_v41  ;;  %v286_v50 = vcombine.high %v264_v45, %v264_v45  ;;  %v2103_v62 = vld [vmem:[%s2814_s1 + $0x1a8] sm:$0xff]   ;;  %v2107_v2 = vld [vmem:[%s2814_s1 + $0x1a0] sm:$0xff]   ;;  %v2110_v3 = vld [vmem:[%s2814_s1 + $0x1d8] sm:$0xff]  }
  0x12   :  { %1850 = vmatprep.subr.bf16.mxu1 %v2077_v18  ;;  %v2109_v4 = vld [vmem:[%s2814_s1 + $0x118] sm:$0xff]   ;;  %v2112_v5 = vld [vmem:[%s2814_s1 + $0x150] sm:$0xff]   ;;  %v2116_v9 = vld [vmem:[%s2814_s1 + $0x148] sm:$0xff]  }
  0x13   :  { %1829 = vmatpush3.bf16.msra.mxu0 %v2076_v17  ;;  %v285_v49 = vrot.slane %v257_v46, %v2345_v41  ;;  %977 = vmatprep.mubr.bf16.mxu0 %v278_v47  ;;  %v288_v52 = vcombine.high %v278_v47, %v278_v47  ;;  %v2111_v6 = vld [vmem:[%s2814_s1 + $0x198] sm:$0xff]   ;;  %v2114_v7 = vld [vmem:[%s2814_s1 + $0x1d0] sm:$0xff]   ;;  %v2118_v11 = vld [vmem:[%s2814_s1 + $0x1c8] sm:$0xff]   ;;  %v271_v17 = vrot.slane %v2349_v43, %v2345_v41 }
  0x14   :  { %1830 = vmatprep.subr.bf16.mxu0 %v2079_v20  ;;  %v2113_v8 = vld [vmem:[%s2814_s1 + $0x110] sm:$0xff]   ;;  %v2117_v12 = vld [vmem:[%s2814_s1 + $0x108] sm:$0xff]   ;;  %v2120_v13 = vld [vmem:[%s2814_s1 + $0x140] sm:$0xff]  }
  0x15   :  { %1851 = vmatpush3.bf16.msra.mxu1 %v2078_v19  ;;  %v289_v55 = vcombine.high %v285_v49, %v285_v49  ;;  %1017 = vmatprep.mubr.bf16.mxu1 %v288_v52  ;;  %v2115_v10 = vld [vmem:[%s2814_s1 + $0x190] sm:$0xff]   ;;  %v2119_v14 = vld [vmem:[%s2814_s1 + $0x188] sm:$0xff]   ;;  %v2122_v15 = vld [vmem:[%s2814_s1 + $0x1c0] sm:$0xff]  }
  0x16   :  { %1852 = vmatprep.subr.bf16.mxu1 %v2081_v22  ;;  %v2121_v16 = vld [vmem:[%s2814_s1 + $0x100] sm:$0xff]   ;;  %v2124_v18 = vld [vmem:[%s2814_s1 + $0x278] sm:$0xff]   ;;  %v287_v22 = vcombine.high %v271_v17, %v271_v17  ;;  %v2132_v27 = vld [vmem:[%s2814_s1 + $0x268] sm:$0xff]  }
  0x17   :  { %1831 = vmatpush3.bf16.msra.mxu0 %v2080_v21  ;;  %v2123_v19 = vld [vmem:[%s2814_s1 + $0x180] sm:$0xff]   ;;  %v2126_v20 = vld [vmem:[%s2814_s1 + $0x2f8] sm:$0xff]   ;;  %v2135_v33 = vld [vmem:[%s2814_s1 + $0x2a8] sm:$0xff]  }
  0x18   :  { %1832 = vmatprep.subr.bf16.mxu0 %v2083_v24  ;;  %v2125_v21 = vld [vmem:[%s2814_s1 + $0x238] sm:$0xff]   ;;  %v2137_v35 = vld [vmem:[%s2814_s1 + $0x220] sm:$0xff]   ;;  %v2146_v43 = vld [vmem:[%s2814_s1 + $0x2d0] sm:$0xff]  }
  0x19   :  { %1853 = vmatpush3.bf16.msra.mxu1 %v2082_v23  ;;  %v2128_v23 = vld [vmem:[%s2814_s1 + $0x270] sm:$0xff]   ;;  %v2127_v24 = vld [vmem:[%s2814_s1 + $0x2b8] sm:$0xff]   ;;  %v36_v46 = vld [vmem:[%s2813_s0 + $0x8] sm:$0x1f] }
  0x1a   :  { %1854 = vmatprep.subr.bf16.mxu1 %v2085_v26  ;;  %v2129_v26 = vld [vmem:[%s2814_s1 + $0x230] sm:$0xff]   ;;  %v2140_v36 = vld [vmem:[%s2814_s1 + $0x258] sm:$0xff]   ;;  %v2152_v52 = vld [vmem:[%s2814_s1 + $0x240] sm:$0xff]  }
  0x1b   :  { %1833 = vmatpush3.bf16.msra.mxu0 %v2084_v25  ;;  %v2130_v25 = vld [vmem:[%s2814_s1 + $0x2f0] sm:$0xff]   ;;  %v2142_v38 = vld [vmem:[%s2814_s1 + $0x2d8] sm:$0xff]  }
  0x1c   :  { %1834 = vmatprep.subr.bf16.mxu0 %v2087_v29  ;;  %v2134_v29 = vld [vmem:[%s2814_s1 + $0x2e8] sm:$0xff]   ;;  %v2141_v39 = vld [vmem:[%s2814_s1 + $0x218] sm:$0xff]   ;;  %v2145_v44 = vld [vmem:[%s2814_s1 + $0x210] sm:$0xff]  }
  0x1d   :  { %1855 = vmatpush3.bf16.msra.mxu1 %v2086_v28  ;;  %v2131_v28 = vld [vmem:[%s2814_s1 + $0x2b0] sm:$0xff]   ;;  %v2143_v42 = vld [vmem:[%s2814_s1 + $0x298] sm:$0xff]  }
  0x1e   :  { %1856 = vmatprep.subr.bf16.mxu1 %v2089_v31  ;;  %v2136_v31 = vld [vmem:[%s2814_s1 + $0x260] sm:$0xff]   ;;  %v2147_v47 = vld [vmem:[%s2814_s1 + $0x290] sm:$0xff]  }
  0x1f   :  { %1835 = vmatpush3.bf16.msra.mxu0 %v2088_v30  ;;  %v2133_v30 = vld [vmem:[%s2814_s1 + $0x228] sm:$0xff]  }
  0x20   :  { %1864 = vmatprep.subr.bf16.mxu0 %v2092_v37  ;;  %v2139_v37 = vld [vmem:[%s2814_s1 + $0x2a0] sm:$0xff]  }
  0x21   :  { %1857 = vmatpush3.bf16.msra.mxu1 %v2091_v34  ;;  %v2138_v34 = vld [vmem:[%s2814_s1 + $0x2e0] sm:$0xff]  }
  0x22   :  { %1886 = vmatprep.subr.bf16.mxu1 %v2094_v40  ;;  %978 = vmatmul.mubr.bf16.vlgmr.msra.gmra.mxu0 %v264_v45  ;;  %v2144_v40 = vld [vmem:[%s2814_s1 + $0x250] sm:$0xff]   ;;  %v2148_v45 = vld [vmem:[%s2814_s1 + $0x248] sm:$0xff]  }
  0x23   :  { %1865 = vmatpush3.bf16.msra.mxu0 %v2093_v48  ;;  %1057 = vmatprep.mubr.bf16.mxu0 %v285_v49  ;;  %v297_v48 = vrot.slane %v36_v46, %v2345_v41  ;;  %v2150_v49 = vld [vmem:[%s2814_s1 + $0x2c8] sm:$0xff]  }
  0x24   :  { %1018 = vmatmul.mubr.bf16.vlgmr.msra.gmra.mxu1 %v286_v50  ;;  %1866 = vmatprep.subr.bf16.mxu0 %v2096_v51  ;;  %v2149_v50 = vld [vmem:[%s2814_s1 + $0x208] sm:$0xff]  }
  0x25   :  { %1887 = vmatpush3.bf16.msra.mxu1 %v2095_v53  ;;  %1097 = vmatprep.mubr.bf16.mxu1 %v289_v55  ;;  %v305_v51 = vcombine.high %v297_v48, %v297_v48  ;;  %v2151_v53 = vld [vmem:[%s2814_s1 + $0x288] sm:$0xff]  }
  0x26   :  { %1888 = vmatprep.subr.bf16.mxu1 %v2098_v54 }
  0x27   :  { %1867 = vmatpush3.bf16.msra.mxu0 %v2097_v56  ;;  %v326_v54 = vrot.slane %v305_v51, %v2345_v41 }
  0x28   :  { %1868 = vmatprep.subr.bf16.mxu0 %v2100_v57 }
  0x29   :  { %1889 = vmatpush3.bf16.msra.mxu1 %v2099_v58 }
  0x2a   :  { %1890 = vmatprep.subr.bf16.mxu1 %v2102_v59 }
  0x2b   :  { %1869 = vmatpush3.bf16.msra.mxu0 %v2101_v60 }
  0x2c   :  { %1870 = vmatprep.subr.bf16.mxu0 %v2104_v61 }
  0x2d   :  { %1891 = vmatpush3.bf16.msra.mxu1 %v2103_v62 }
  0x2e   :  { %1892 = vmatprep.subr.bf16.mxu1 %v2106_v63 }
  0x2f   :  { %1871 = vmatpush3.bf16.msra.mxu0 %v2105_v0 }
  0x30   :  { %1872 = vmatprep.subr.bf16.mxu0 %v2108_v1 }
  0x31   :  { %1893 = vmatpush3.bf16.msra.mxu1 %v2107_v2 }
  0x32   :  { %1894 = vmatprep.subr.bf16.mxu1 %v2110_v3 }
  0x33   :  { %1873 = vmatpush3.bf16.msra.mxu0 %v2109_v4 }
  0x34   :  { %1874 = vmatprep.subr.bf16.mxu0 %v2112_v5 }
  0x35   :  { %1895 = vmatpush3.bf16.msra.mxu1 %v2111_v6 }
  0x36   :  { %1896 = vmatprep.subr.bf16.mxu1 %v2114_v7 }
  0x37   :  { %1875 = vmatpush3.bf16.msra.mxu0 %v2113_v8 }
  0x38   :  { %1876 = vmatprep.subr.bf16.mxu0 %v2116_v9 }
  0x39   :  { %1897 = vmatpush3.bf16.msra.mxu1 %v2115_v10 }
  0x3a   :  { %1898 = vmatprep.subr.bf16.mxu1 %v2118_v11 }
  0x3b   :  { %1877 = vmatpush3.bf16.msra.mxu0 %v2117_v12 }
  0x3c   :  { %1878 = vmatprep.subr.bf16.mxu0 %v2120_v13 }
  0x3d   :  { %1899 = vmatpush3.bf16.msra.mxu1 %v2119_v14 }
  0x3e   :  { %1900 = vmatprep.subr.bf16.mxu1 %v2122_v15 }
  0x3f   :  { %1879 = vmatpush3.bf16.msra.mxu0 %v2121_v16 }
  0x40   :  { %1908 = vmatprep.subr.bf16.mxu0 %v2124_v18 }
  0x41   :  { %1901 = vmatpush3.bf16.msra.mxu1 %v2123_v19 }
  0x42   :  { %1058 = vmatmul.mubr.bf16.vlgmr.msra.gmra.mxu0 %v271_v17  ;;  %1930 = vmatprep.subr.bf16.mxu1 %v2126_v20 }
  0x43   :  { %1909 = vmatpush3.bf16.msra.mxu0 %v2125_v21 }
  0x44   :  { %1098 = vmatmul.mubr.bf16.vlgmr.msra.gmra.mxu1 %v287_v22  ;;  %1910 = vmatprep.subr.bf16.mxu0 %v2128_v23 }
  0x45   :  { %1931 = vmatpush3.bf16.msra.mxu1 %v2127_v24 }
  0x46   :  { %1932 = vmatprep.subr.bf16.mxu1 %v2130_v25 }
  0x47   :  { %1911 = vmatpush3.bf16.msra.mxu0 %v2129_v26 }
  0x48   :  { %1912 = vmatprep.subr.bf16.mxu0 %v2132_v27 }
  0x49   :  { %1933 = vmatpush3.bf16.msra.mxu1 %v2131_v28 }
  0x4a   :  { %1934 = vmatprep.subr.bf16.mxu1 %v2134_v29 }
  0x4b   :  { %1913 = vmatpush3.bf16.msra.mxu0 %v2133_v30 }
  0x4c   :  { %1914 = vmatprep.subr.bf16.mxu0 %v2136_v31 }
  0x4d   :  { %1935 = vmatpush3.bf16.msra.mxu1 %v2135_v33 }
  0x4e   :  { %1936 = vmatprep.subr.bf16.mxu1 %v2138_v34 }
  0x4f   :  { %1915 = vmatpush3.bf16.msra.mxu0 %v2137_v35 }
  0x50   :  { %1916 = vmatprep.subr.bf16.mxu0 %v2140_v36 }
  0x51   :  { %1937 = vmatpush3.bf16.msra.mxu1 %v2139_v37 }
  0x52   :  { %1938 = vmatprep.subr.bf16.mxu1 %v2142_v38 }
  0x53   :  { %1917 = vmatpush3.bf16.msra.mxu0 %v2141_v39 }
  0x54   :  { %1918 = vmatprep.subr.bf16.mxu0 %v2144_v40 }
  0x55   :  { %1939 = vmatpush3.bf16.msra.mxu1 %v2143_v42 }
  0x56   :  { %1940 = vmatprep.subr.bf16.mxu1 %v2146_v43 }
  0x57   :  { %1919 = vmatpush3.bf16.msra.mxu0 %v2145_v44 }
  0x58   :  { %1920 = vmatprep.subr.bf16.mxu0 %v2148_v45 }
  0x59   :  { %1941 = vmatpush3.bf16.msra.mxu1 %v2147_v47 }
  0x5a   :  { %15 = vsyncpa [#allocation4], 0  ;;  %1942 = vmatprep.subr.bf16.mxu1 %v2150_v49  ;;  %v2154_v55 = vld [vmem:[%s2814_s1 + $0x2c0] sm:$0xff]   ;;  %1137 = vmatprep.mubr.bf16.mxu0 %v326_v54  ;;  %v328_v57 = vcombine.high %v326_v54, %v326_v54  ;;  %v312_v58 = vrot.slane %v297_v48, %v2345_v41  ;;  %v2157_v60 = vld [vmem:[%s2814_s1 + $0x318] sm:$0xff]   ;;  %v2184_v61 = vmov 0.0   ;;  %vm2185_vm0 = vmmov 0  }
  0x5b   :  { %1921 = vmatpush3.bf16.msra.mxu0 %v2149_v50  ;;  %v2153_v56 = vld [vmem:[%s2814_s1 + $0x200] sm:$0xff]   ;;  %v2158_v63 = vld [vmem:[%s2814_s1 + $0x310] sm:$0xff]   ;;  %v290_v0 = vcombine.high %v36_v46, %v36_v46  ;;  %v2159_v1 = vld [vmem:[%s2814_s1 + $0x308] sm:$0xff]   ;;  %vm941_vm1 = vcmask 523264   ;;  %v238_v28 = vstv %s2815_s2  ;;  %vm1252_vm2 = vcmask 64512  }
  0x5c   :  { %1922 = vmatprep.subr.bf16.mxu0 %v2152_v52  ;;  %v2156_v59 = vld [vmem:[%s2814_s1 + $0x280] sm:$0xff]   ;;  %1177 = vmatprep.mubr.bf16.mxu1 %v328_v57  ;;  %v327_v62 = vcombine.high %v312_v58, %v312_v58  ;;  %v1227_v5 = vld [vmem:[%s2816_s3 + $0x8] sm:$0xff]  ;;  %v1229_v7 = vld [vmem:[%s2816_s3 + $0x18] sm:$0xff]  ;;  %vm1625_vm3 = vcmask 261120  }
  0x5d   :  { %1943 = vmatpush3.bf16.msra.mxu1 %v2151_v53  ;;  %v304_v2 = vrot.slane %v290_v0, %v2345_v41  ;;  %v2160_v3 = vld [vmem:[%s2814_s1 + $0x300] sm:$0xff]   ;;  %v1449_v8 = vld [vmem:[%s2818_s5 + $0x178] sm:$0xff]  ;;  %v1464_v9 = vld [vmem:[%s2818_s5 + $0x1f0] sm:$0xff] }
  0x5e   :  { %1944 = vmatprep.subr.bf16.mxu1 %v2154_v55  ;;  %v1226_v6 = vld [vmem:[%s2816_s3] sm:$0xff]  ;;  %v1448_v10 = vld [vmem:[%s2818_s5 + $0x170] sm:$0xff]  ;;  %v1463_v11 = vld [vmem:[%s2818_s5 + $0x1e8] sm:$0xff] }
  0x5f   :  { %1923 = vmatpush3.bf16.msra.mxu0 %v2153_v56  ;;  %v319_v4 = vrot.slane %v304_v2, %v2345_v41  ;;  %v1465_v41 = vld [vmem:[%s2818_s5 + $0x1f8] sm:$0xff]  ;;  %v1447_v12 = vld [vmem:[%s2818_s5 + $0x168] sm:$0xff]  ;;  %v1462_v13 = vld [vmem:[%s2818_s5 + $0x1e0] sm:$0xff] }
  0x60   :  { %2032 = vmatprep.subr.bf16.mxu0 %v2184_v61  ;;  %v1446_v14 = vld [vmem:[%s2818_s5 + $0x160] sm:$0xff]  ;;  %v1461_v15 = vld [vmem:[%s2818_s5 + $0x1d8] sm:$0xff]  ;;  %v1460_v17 = vld [vmem:[%s2818_s5 + $0x1d0] sm:$0xff] }
  0x61   :  { %1945 = vmatpush3.bf16.msra.mxu1 %v2156_v59  ;;  %v1445_v16 = vld [vmem:[%s2818_s5 + $0x158] sm:$0xff]  ;;  %v1444_v18 = vld [vmem:[%s2818_s5 + $0x150] sm:$0xff]  ;;  %v1459_v19 = vld [vmem:[%s2818_s5 + $0x1c8] sm:$0xff] }
  0x62   :  { %1138 = vmatmul.mubr.bf16.vlgmr.msra.gmra.mxu0 %v312_v58  ;;  %1286 = vmatprep.subr.mxu1 %v1227_v5  ;;  %v1443_v20 = vld [vmem:[%s2818_s5 + $0x148] sm:$0xff]  ;;  %v1458_v21 = vld [vmem:[%s2818_s5 + $0x1c0] sm:$0xff]  ;;  %v1457_v23 = vld [vmem:[%s2818_s5 + $0x1b8] sm:$0xff] }
  0x63   :  { %2033 = vmatpush3.bf16.msra.mxu0 %v2157_v60  ;;  %2040 = vmatprep.mubr.msk.bf16.mxu0 %vm2185_vm0, %v2184_v61  ;;  %v1442_v22 = vld [vmem:[%s2818_s5 + $0x140] sm:$0xff]  ;;  %v1441_v24 = vld [vmem:[%s2818_s5 + $0x138] sm:$0xff]  ;;  %v1456_v25 = vld [vmem:[%s2818_s5 + $0x1b0] sm:$0xff] }
  0x64   :  { %1178 = vmatmul.mubr.bf16.vlgmr.msra.gmra.mxu1 %v327_v62  ;;  %2034 = vmatprep.subr.bf16.mxu0 %v2184_v61  ;;  %v1440_v26 = vld [vmem:[%s2818_s5 + $0x130] sm:$0xff] }
  0x65   :  { %1320 = vmatprep.mubr.f32.mxu1 %v2184_v61  ;;  %1287 = vmatpush1.msra.mxu1 %v1226_v6 }
  0x66   :  { %1357 = vmatprep.subr.mxu1 %v1229_v7  ;;  %v1228_v7 = vld [vmem:[%s2816_s3 + $0x10] sm:$0xff] }
  0x67   :  { %2035 = vmatpush3.bf16.msra.mxu0 %v2158_v63 }
  0x68   :  { %2036 = vmatprep.subr.bf16.mxu0 %v2184_v61 }
  0x6b   :  { %2037 = vmatpush3.bf16.msra.mxu0 %v2159_v1 }
  0x6c   :  { %2038 = vmatprep.subr.bf16.mxu0 %v2184_v61 }
  0x6f   :  { %2039 = vmatpush3.bf16.msra.mxu0 %v2160_v3 }
  0x70   :  { %1992 = vmatprep.subr.mxu0 %v1465_v41 }
  0x72   :  { %2041 = vmatmul.mubr.msk.bf16.vlgmr.msra.gmra.mxu0 %vm941_vm1, %v319_v4 }
  0x73   :  { %1993 = vmatpush3.msra.mxu0 %v1449_v8  ;;  %v1433_v8 = vld [vmem:[%s2818_s5 + $0xf8] sm:$0xff] }
  0x74   :  { %1994 = vmatprep.subr.mxu0 %v1464_v9 }
  0x75   :  { %1995 = vmatpush3.msra.mxu0 %v1448_v10  ;;  %v1417_v10 = vld [vmem:[%s2818_s5 + $0x78] sm:$0xff] }
  0x76   :  { %1996 = vmatprep.subr.mxu0 %v1463_v11  ;;  %v1432_v11 = vld [vmem:[%s2818_s5 + $0xf0] sm:$0xff] }
  0x77   :  { %1997 = vmatpush3.msra.mxu0 %v1447_v12  ;;  %v1416_v12 = vld [vmem:[%s2818_s5 + $0x70] sm:$0xff] }
  0x78   :  { %1998 = vmatprep.subr.mxu0 %v1462_v13  ;;  %v1431_v13 = vld [vmem:[%s2818_s5 + $0xe8] sm:$0xff] }
  0x79   :  { %1999 = vmatpush3.msra.mxu0 %v1446_v14  ;;  %v1415_v14 = vld [vmem:[%s2818_s5 + $0x68] sm:$0xff] }
  0x7a   :  { %2000 = vmatprep.subr.mxu0 %v1461_v15  ;;  %v1430_v15 = vld [vmem:[%s2818_s5 + $0xe0] sm:$0xff] }
  0x7b   :  { %2001 = vmatpush3.msra.mxu0 %v1445_v16  ;;  %v1414_v16 = vld [vmem:[%s2818_s5 + $0x60] sm:$0xff] }
  0x7c   :  { %2002 = vmatprep.subr.mxu0 %v1460_v17  ;;  %v1429_v17 = vld [vmem:[%s2818_s5 + $0xd8] sm:$0xff] }
  0x7d   :  { %2003 = vmatpush3.msra.mxu0 %v1444_v18  ;;  %v1413_v18 = vld [vmem:[%s2818_s5 + $0x58] sm:$0xff] }
  0x7e   :  { %2004 = vmatprep.subr.mxu0 %v1459_v19  ;;  %v1428_v19 = vld [vmem:[%s2818_s5 + $0xd0] sm:$0xff] }
  0x7f   :  { %2005 = vmatpush3.msra.mxu0 %v1443_v20  ;;  %v1412_v20 = vld [vmem:[%s2818_s5 + $0x50] sm:$0xff] }
  0x80   :  { %2006 = vmatprep.subr.mxu0 %v1458_v21  ;;  %v1427_v21 = vld [vmem:[%s2818_s5 + $0xc8] sm:$0xff] }
  0x81   :  { %2007 = vmatpush3.msra.mxu0 %v1442_v22  ;;  %v1411_v22 = vld [vmem:[%s2818_s5 + $0x48] sm:$0xff] }
  0x82   :  { %2008 = vmatprep.subr.mxu0 %v1457_v23  ;;  %v1426_v23 = vld [vmem:[%s2818_s5 + $0xc0] sm:$0xff] }
  0x83   :  { %2009 = vmatpush3.msra.mxu0 %v1441_v24  ;;  %v1410_v24 = vld [vmem:[%s2818_s5 + $0x40] sm:$0xff] }
  0x84   :  { %2010 = vmatprep.subr.mxu0 %v1456_v25  ;;  %v1425_v25 = vld [vmem:[%s2818_s5 + $0xb8] sm:$0xff] }
  0x85   :  { %2011 = vmatpush3.msra.mxu0 %v1440_v26  ;;  %v1409_v26 = vld [vmem:[%s2818_s5 + $0x38] sm:$0xff] }
  0xe2   :  { %v1836_v27 = vpop.f32.mrf.mxu0 }
  0xe4   :  { %v1837_v29 = vpop.f32.mrf.mxu0  ;;  %v1858_v30 = vpop.f32.mrf.mxu1 }
  0xe5   :  { %v1838_v31 = vadd.f32 %v1837_v29, %v1836_v27  ;;  %v1424_v27 = vld [vmem:[%s2818_s5 + $0xb0] sm:$0xff]  ;;  %v1423_v29 = vld [vmem:[%s2818_s5 + $0xa8] sm:$0xff] }
  0xe6   :  { %v1839_v33 = vpop.f32.mrf.mxu0  ;;  %v1859_v34 = vpop.f32.mrf.mxu1 }
  0xe7   :  { %v980_v35 = vadd.f32 %v1838_v31, %v238_v28  ;;  %v1860_v36 = vadd.f32 %v1859_v34, %v1858_v30  ;;  %v1408_v28 = vld [vmem:[%s2818_s5 + $0x30] sm:$0xff]  ;;  %v1407_v30 = vld [vmem:[%s2818_s5 + $0x28] sm:$0xff]  ;;  %v1422_v31 = vld [vmem:[%s2818_s5 + $0xa0] sm:$0xff] }
  0xe8   :  { %v1840_v37 = vpop.f32.mrf.mxu0  ;;  %v1861_v38 = vpop.f32.mrf.mxu1  ;;  %v1406_v33 = vld [vmem:[%s2818_s5 + $0x20] sm:$0xff]  ;;  %v1421_v34 = vld [vmem:[%s2818_s5 + $0x98] sm:$0xff] }
  0xe9   :  { %v1020_v39 = vadd.f32 %v1860_v36, %v980_v35  ;;  %v1455_v35 = vld [vmem:[%s2818_s5 + $0x1a8] sm:$0xff]  ;;  %v1405_v36 = vld [vmem:[%s2818_s5 + $0x18] sm:$0xff]  ;;  %v1420_v38 = vld [vmem:[%s2818_s5 + $0x90] sm:$0xff] }
  0xea   :  { %v1862_v40 = vpop.f32.mrf.mxu1  ;;  %2012 = vmatprep.subr.mxu0 %v1455_v35  ;;  %v1439_v37 = vld [vmem:[%s2818_s5 + $0x128] sm:$0xff] }
  0xeb   :  { %2013 = vmatpush3.msra.mxu0 %v1439_v37  ;;  %v1404_v40 = vld [vmem:[%s2818_s5 + $0x10] sm:$0xff] }
 0x102   :  { %v1880_v42 = vpop.f32.mrf.mxu0 }
 0x104   :  { %v1881_v43 = vpop.f32.mrf.mxu0  ;;  %v1902_v44 = vpop.f32.mrf.mxu1 }
 0x105   :  { %v1882_v51 = vadd.f32 %v1881_v43, %v1880_v42  ;;  %v1438_v42 = vld [vmem:[%s2818_s5 + $0x120] sm:$0xff]  ;;  %v1419_v43 = vld [vmem:[%s2818_s5 + $0x88] sm:$0xff] }
 0x106   :  { %v1883_v45 = vpop.f32.mrf.mxu0  ;;  %v1903_v46 = vpop.f32.mrf.mxu1 }
 0x107   :  { %v1060_v56 = vadd.f32 %v1882_v51, %v1020_v39  ;;  %v1904_v57 = vadd.f32 %v1903_v46, %v1902_v44  ;;  %v1454_v39 = vld [vmem:[%s2818_s5 + $0x1a0] sm:$0xff]  ;;  %v1453_v44 = vld [vmem:[%s2818_s5 + $0x198] sm:$0xff]  ;;  %v1403_v45 = vld [vmem:[%s2818_s5 + $0x8] sm:$0xff] }
 0x108   :  { %v1884_v47 = vpop.f32.mrf.mxu0  ;;  %v1905_v48 = vpop.f32.mrf.mxu1  ;;  %2014 = vmatprep.subr.mxu0 %v1454_v39  ;;  %v1437_v46 = vld [vmem:[%s2818_s5 + $0x118] sm:$0xff]  ;;  %v1451_v51 = vld [vmem:[%s2818_s5 + $0x188] sm:$0xff] }
 0x109   :  { %v1100_v63 = vadd.f32 %v1904_v57, %v1060_v56  ;;  %2015 = vmatpush3.msra.mxu0 %v1438_v42  ;;  %v1418_v47 = vld [vmem:[%s2818_s5 + $0x80] sm:$0xff]  ;;  %v1452_v48 = vld [vmem:[%s2818_s5 + $0x190] sm:$0xff]  ;;  %v1238_v57 = vsub.s32 1, %v2330_v32 }
 0x10a   :  { %v1906_v49 = vpop.f32.mrf.mxu1  ;;  %2016 = vmatprep.subr.mxu0 %v1453_v44  ;;  %v1230_v56 = vld [vmem:[%s2817_s4] sm:$0xf] }
 0x10b   :  { %2017 = vmatpush3.msra.mxu0 %v1437_v46  ;;  %v1402_v49 = vld [vmem:[%s2818_s5] sm:$0xff] }
 0x10c   :  { %2018 = vmatprep.subr.mxu0 %v1452_v48 }
 0x122   :  { %v1924_v50 = vpop.f32.mrf.mxu0 }
 0x124   :  { %v1925_v52 = vpop.f32.mrf.mxu0  ;;  %v1946_v53 = vpop.f32.mrf.mxu1 }
 0x125   :  { %v1926_v60 = vadd.f32 %v1925_v52, %v1924_v50  ;;  %v1436_v50 = vld [vmem:[%s2818_s5 + $0x110] sm:$0xff]  ;;  %v1435_v52 = vld [vmem:[%s2818_s5 + $0x108] sm:$0xff] }
 0x126   :  { %v1927_v54 = vpop.f32.mrf.mxu0  ;;  %v1947_v55 = vpop.f32.mrf.mxu1  ;;  %2019 = vmatpush3.msra.mxu0 %v1436_v50 }
 0x127   :  { %v1140_v0 = vadd.f32 %v1926_v60, %v1100_v63  ;;  %v1948_v1 = vadd.f32 %v1947_v55, %v1946_v53  ;;  %2020 = vmatprep.subr.mxu0 %v1451_v51  ;;  %v1450_v53 = vld [vmem:[%s2818_s5 + $0x180] sm:$0xff]  ;;  %v1234_v55 = vsub.s32 0, %v2330_v32  ;;  %v1239_v60 = vrot.slane %v1230_v56, %v1238_v57 }
 0x128   :  { %v1928_v58 = vpop.f32.mrf.mxu0  ;;  %v1949_v59 = vpop.f32.mrf.mxu1  ;;  %2021 = vmatpush3.msra.mxu0 %v1435_v52  ;;  %v1434_v54 = vld [vmem:[%s2818_s5 + $0x100] sm:$0xff] }
 0x129   :  { %v1180_v2 = vadd.f32 %v1948_v1, %v1140_v0  ;;  %2022 = vmatprep.subr.mxu0 %v1450_v53  ;;  %v1235_v58 = vrot.slane %v1230_v56, %v1234_v55  ;;  %v1242_v59 = vsub.s32 2, %v2330_v32 }
 0x12a   :  { %v1950_v62 = vpop.f32.mrf.mxu1  ;;  %2023 = vmatpush3.msra.mxu0 %v1434_v54 }
 0x12b   :  { %v1246_v62 = vsub.s32 3, %v2330_v32  ;;  %v1617_v32 = vld [vmem:[%s2820_s7 + $0x18] sm:$0xff] }
 0x132   :  { %v1219_v3 = vpop.f32.mrf.mxu0 }
 0x133   :  { %v1220_v4 = vadd.f32 %v1219_v3, %v1180_v2  ;;  %v1243_v2 = vrot.slane %v1230_v56, %v1242_v59 }
 0x134   :  { %v2042_v5 = vpop.f32.mrf.mxu0 }
 0x135   :  { %v1225_v6 = vmax.f32 %v1220_v4, 0.0  ;;  %v1247_v4 = vrot.slane %v1230_v56, %v1246_v62 }
 0x136   :  { %v1222_v41 = vpop.f32.mrf.mxu0 }
 0x137   :  { %1815 = vmatmul.mubr.msk.f32.vlgmr.msra.gmra.mxu1 %vm1252_vm2, %v1225_v6 }
 0x138   :  { %1358 = vmatpush1.msra.mxu1 %v1228_v7  ;;  %v2043_v9 = vpop.f32.mrf.mxu0  ;;  %1391 = vmatprep.mubr.f32.mxu1 %v2184_v61 }
 0x139   :  { %1957 = vmatprep.subr.mxu1 %v1433_v8 }
 0x13b   :  { %1816 = vmatmul.mubr.msk.f32.vlgmr.msra.gmra.mxu1 %vm1252_vm2, %v1225_v6 }
 0x13c   :  { %1958 = vmatpush3.msra.mxu1 %v1417_v10 }
 0x13d   :  { %1959 = vmatprep.subr.mxu1 %v1432_v11 }
 0x13e   :  { %1960 = vmatpush3.msra.mxu1 %v1416_v12  ;;  %v1616_v12 = vld [vmem:[%s2820_s7 + $0x10] sm:$0xff] }
 0x13f   :  { %1961 = vmatprep.subr.mxu1 %v1431_v13  ;;  %v1615_v13 = vld [vmem:[%s2820_s7 + $0x8] sm:$0xff] }
 0x140   :  { %1962 = vmatpush3.msra.mxu1 %v1415_v14  ;;  %v1614_v14 = vld [vmem:[%s2820_s7] sm:$0xff]  ;;  %s2186_s7 = smov [#allocation3]  }
 0x141   :  { %1963 = vmatprep.subr.mxu1 %v1430_v15  ;;  %s1706_s26 = sshll.u32 %s2186_s7, 4  ;;  %s1707_s26 = int_to_ptr.vmem [resolvable:$true] %s1706_s26 }
 0x142   :  { %1964 = vmatpush3.msra.mxu1 %v1414_v16  ;;  %p2166_p1 = scmp.lt.s32.totalorder %s1707_s26, %s1707_s26 }
 0x143   :  { %1965 = vmatprep.subr.mxu1 %v1429_v17 }
 0x144   :  { %1966 = vmatpush3.msra.mxu1 %v1413_v18  ;;  %v1817_v18 = vld [vmem:[%s2819_s6] ss:$0 sm:$0xff]  ;;  %s2161_s6 = scalar_lea.vmem %s1707_s26, 32 }
 0x145   :  { %1967 = vmatprep.subr.mxu1 %v1428_v19  ;;  %p2162_p0 = scmp.ne.s32.totalorder %s1707_s26, %s2161_s6  ;;  %p2167_p2 = scmp.lt.s32.totalorder %s2161_s6, %s2161_s6 }
 0x146   :  { %1968 = vmatpush3.msra.mxu1 %v1412_v20 }
 0x147   :  { %1969 = vmatprep.subr.mxu1 %v1427_v21  ;;  %p2168_p3 = por %p2167_p2, %p2166_p1 }
 0x148   :  { %1970 = vmatpush3.msra.mxu1 %v1411_v22 }
 0x149   :  { %1971 = vmatprep.subr.mxu1 %v1426_v23  ;;  %p2169_p4 = pnand %p2168_p3, %p2162_p0 }
 0x14a   :  { %1972 = vmatpush3.msra.mxu1 %v1410_v24 }
 0x14b   :  { %1973 = vmatprep.subr.mxu1 %v1425_v25 }
 0x14c   :  { %1974 = vmatpush3.msra.mxu1 %v1409_v26 }
 0x14d   :  { %1975 = vmatprep.subr.mxu1 %v1424_v27 }
 0x14e   :  { %1976 = vmatpush3.msra.mxu1 %v1408_v28 }
 0x14f   :  { %1977 = vmatprep.subr.mxu1 %v1423_v29 }
 0x150   :  { %1978 = vmatpush3.msra.mxu1 %v1407_v30 }
 0x151   :  { %1979 = vmatprep.subr.mxu1 %v1422_v31 }
 0x152   :  { %1980 = vmatpush3.msra.mxu1 %v1406_v33 }
 0x153   :  { %1981 = vmatprep.subr.mxu1 %v1421_v34 }
 0x154   :  { %1982 = vmatpush3.msra.mxu1 %v1405_v36 }
 0x155   :  { %1983 = vmatprep.subr.mxu1 %v1420_v38 }
 0x156   :  { %1984 = vmatpush3.msra.mxu1 %v1404_v40 }
 0x157   :  { %1985 = vmatprep.subr.mxu1 %v1419_v43 }
 0x158   :  { %1986 = vmatpush3.msra.mxu1 %v1403_v45 }
 0x159   :  { %1987 = vmatprep.subr.mxu1 %v1418_v47 }
 0x15a   :  { %1988 = vmatpush3.msra.mxu1 %v1402_v49 }
 0x15b   :  { %2044 = vmatprep.subr.mxu1 %v2184_v61 }
 0x1f7   :  { %v1322_v63 = vpop.f32.mrf.mxu1 }
 0x1f8   :  { %v1323_v0 = vadd.f32 %v1322_v63, %v1235_v58 }
 0x1f9   :  { %v1324_v1 = vpop.f32.mrf.mxu1 }
 0x1fa   :  { %v1325_v3 = vadd.f32 %v1324_v1, %v1239_v60  ;;  %v1398_v7 = vmax.f32 %v1323_v0, 0.0 }
 0x1fb   :  { %v1393_v5 = vpop.f32.mrf.mxu1 }
 0x1fc   :  { %v1399_v6 = vmax.f32 %v1325_v3, 0.0  ;;  %v1394_v41 = vadd.f32 %v1393_v5, %v1243_v2 }
 0x1fd   :  { %v1395_v8 = vpop.f32.mrf.mxu1 }
 0x1fe   :  { %v1396_v9 = vadd.f32 %v1395_v8, %v1247_v4  ;;  %1537 = vmatprep.mubr.f32.mxu1 %v1399_v6  ;;  %v1400_v11 = vmax.f32 %v1394_v41, 0.0 }
 0x1ff   :  { %1538 = vmatmul.mubr.f32.vlgmr.msra.gmra.mxu1 %v1398_v7 }
 0x200   :  { %v1401_v10 = vmax.f32 %v1396_v9, 0.0  ;;  %2052 = vmatprep.mubr.msk.f32.mxu1 %vm2185_vm0, %v2184_v61  ;;  %2045 = vmatpush3.msra.mxu1 %v1617_v32 }
 0x201   :  { %2046 = vmatprep.subr.mxu1 %v2184_v61 }
 0x202   :  { %1607 = vmatprep.mubr.f32.mxu0 %v1401_v10  ;;  %2047 = vmatpush3.msra.mxu1 %v1616_v12 }
 0x203   :  { %1608 = vmatmul.mubr.f32.vlgmr.msra.gmra.mxu0 %v1400_v11  ;;  %2048 = vmatprep.subr.mxu1 %v2184_v61 }
 0x204   :  { %2049 = vmatpush3.msra.mxu1 %v1615_v13 }
 0x205   :  { %2050 = vmatprep.subr.mxu1 %v2184_v61  ;;  %v1818_v61 = vld [vmem:[%s2821_s8] ss:$0 sm:$0xff] }
 0x206   :  { %2051 = vmatpush3.msra.mxu1 %v1614_v14 }
 0x2bf   :  { %v1989_v15 = vpop.f32.mrf.mxu1 }
 0x2c1   :  { %v1990_v16 = vpop.f32.mrf.mxu1 }
 0x2c2   :  { %v1991_v17 = vadd.f32 %v1990_v16, %v1989_v15 }
 0x2c3   :  { %v2024_v19 = vpop.f32.mrf.mxu0 }
 0x2c4   :  { %v1540_v21 = vadd.f32 %v1991_v17, %v1817_v18 }
 0x2c5   :  { %v2025_v20 = vpop.f32.mrf.mxu0 }
 0x2c6   :  { %v2026_v22 = vadd.f32 %v2025_v20, %v2024_v19 }
 0x2c8   :  { %v1610_v23 = vadd.f32 %v2026_v22, %v1540_v21 }
 0x2ca   :  { %v1613_v24 = vmax.f32 %v1610_v23, 0.0 }
 0x2cc   :  { %2053 = vmatmul.mubr.msk.f32.vlgmr.msra.gmra.mxu1 %vm1625_vm3, %v1613_v24 }
 0x38c   :  { %v1695_v25 = vpop.f32.mrf.mxu1 }
 0x38d   :  { %v1696_v26 = vadd.f32 %v1818_v61, %v1695_v25 }
 0x38e   :  { %v2054_v27 = vpop.f32.mrf.mxu1 }
 0x38f   :  { %1699 = vst [vmem:[#allocation3] sm:$0x3] %v1696_v26 }
 0x390   :  { %2172 = shalt.err (!%p2169_p4)
}
 0x391   :  { %1709 = dma.vmem_to_hbm [thread:$0]  %s1707_s26, 32, %s2822_s9, [#allocation4]  }
 0x392   :  { %2181 = dma.done.wait [#allocation4], 32  }
 0x393   :  { %2182 = vsyncadd [#allocation4], 4294967264 }
 0x394   :  { %1713 = vsyncpa [#allocation4], 1 }

</bundles_post_ra>
